<compile_context>
chip_gen: v7x
topology: tpu7x:2x2x1
jax: 0.10.0
libtpu: 0.0.40
codegen_flags: <defaults>
</compile_context>

<pallas_src>
import jax
import jax.numpy as jnp
from jax.experimental import pallas as pl
from jax.experimental.pallas import tpu as pltpu

_LANES = 128        # lane width: last dim of a vreg
_SUBLANES = 8       # f32 sublane count
_NEG_INF = -1e30    # bias value for padded logit columns


def _round_up(n, m):
    return ((n + m - 1) // m) * m


def _categorical_linear_kernel(x_ref, w_ref, b_ref, logits_ref):
    """Fused linear layer (MXU) + Categorical-logits normalization (log-softmax)."""
    y = jnp.dot(x_ref[...], w_ref[...], preferred_element_type=jnp.float32)
    y = y + b_ref[...]                                   # (TB, Dout_p), f32
    # normalized logits = y - logsumexp(y, axis=-1); max/sum -> XLU, exp/log -> EUP,
    # both off the MXU critical path (free VLIW slots).
    m = jnp.max(y, axis=-1, keepdims=True)
    lse = m + jnp.log(jnp.sum(jnp.exp(y - m), axis=-1, keepdims=True))
    logits_ref[...] = (y - lse).astype(logits_ref.dtype)


def categorical_1d_forward(x, w, b, *, block_b=1024, compute_dtype=None):
    """Normalized logits of Categorical(logits = x @ w + b).

    x: (B, Din), w: (Din, Dout) [transpose of the torch (Dout, Din) weight],
    b: (1, Dout).  Returns (B, Dout) f32 normalized logits.
    compute_dtype: optionally jnp.bfloat16 for x/W on v6e/v7x (f32 accumulation kept).
    """
    B, Din = x.shape
    Din2, Dout = w.shape
    assert Din == Din2 and b.shape == (1, Dout)

    if compute_dtype is not None:
        x = x.astype(compute_dtype)
        w = w.astype(compute_dtype)

    # ---- lane-dense output padding: Dout -> multiple of 128 --------------------
    dout_p = _round_up(Dout, _LANES)
    if dout_p != Dout:
        w_p = jnp.zeros((Din, dout_p), w.dtype).at[:, :Dout].set(w)
        b_p = jnp.full((1, dout_p), _NEG_INF, jnp.float32).at[:, :Dout].set(
            b.astype(jnp.float32))
    else:
        w_p = w
        b_p = b.astype(jnp.float32)

    # ---- small batch: single-shot kernel, no grid / pipeline machinery ---------
    if B <= block_b:
        out = pl.pallas_call(
            _categorical_linear_kernel,
            out_shape=jax.ShapeDtypeStruct((B, dout_p), jnp.float32),
            in_specs=[
                pl.BlockSpec(memory_space=pltpu.MemorySpace.VMEM),
                pl.BlockSpec(memory_space=pltpu.MemorySpace.VMEM),
                pl.BlockSpec(memory_space=pltpu.MemorySpace.VMEM),
            ],
            out_specs=pl.BlockSpec(memory_space=pltpu.MemorySpace.VMEM),
        )(x, w_p, b_p)
        return out[:, :Dout]

    # ---- large batch: tile the batch axis, keep W / bias VMEM-resident ---------
    tb = _round_up(min(block_b, B), _SUBLANES)
    b_pad = _round_up(B, tb)
    if b_pad != B:
        x = jnp.zeros((b_pad, Din), x.dtype).at[:B].set(x)

    out = pl.pallas_call(
        _categorical_linear_kernel,
        out_shape=jax.ShapeDtypeStruct((b_pad, dout_p), jnp.float32),
        grid=(b_pad // tb,),
        in_specs=[
            pl.BlockSpec((tb, Din), lambda i: (i, 0)),       # streamed batch tiles
            pl.BlockSpec((Din, dout_p), lambda i: (0, 0)),   # weights stay resident
            pl.BlockSpec((1, dout_p), lambda i: (0, 0)),     # bias stays resident
        ],
        out_specs=pl.BlockSpec((tb, dout_p), lambda i: (i, 0)),
        compiler_params=pltpu.CompilerParams(
            dimension_semantics=("parallel",)),              # both TCs on v7x
    )(x, w_p, b_p)
    return out[:B, :Dout]


def make_orthogonal_weight(key, num_inputs, num_outputs, gain=0.01):
    # Deterministic stand-in for nn.init.orthogonal_ (gain=0.01) on the
    # (num_outputs, num_inputs) torch weight; we store its transpose (Din, Dout).
    a = jax.random.normal(key, (max(num_inputs, num_outputs),
                                min(num_inputs, num_outputs)), dtype=jnp.float32)
    q, r = jnp.linalg.qr(a)
    q = q * jnp.sign(jnp.diagonal(r))
    w_t = q.T if num_outputs > num_inputs else q
    return (gain * w_t).astype(jnp.float32)    # (Din, Dout)


def _reference(x, w, b):
    y = x @ w + b
    return y - jax.scipy.special.logsumexp(y, axis=-1, keepdims=True)


if __name__ == "__main__":
    key = jax.random.PRNGKey(0)
    k_x, k_w, k_x2 = jax.random.split(key, 3)

    B = 8            # batch
    num_inputs = 32  # hidden features
    num_outputs = 16 # discrete action count

    x = jax.random.normal(k_x, (B, num_inputs), dtype=jnp.float32)
    w = make_orthogonal_weight(k_w, num_inputs, num_outputs, gain=0.01)  # (Din, Dout)
    b = jnp.zeros((1, num_outputs), dtype=jnp.float32)                    # constant_(0)

    # --- single-shot (no-grid) path -------------------------------------------
    logits = categorical_1d_forward(x, w, b)
    jax.block_until_ready(logits)
    ref = _reference(x, w, b)
    assert logits.shape == (B, num_outputs)
    assert jnp.allclose(logits, ref, atol=1e-5, rtol=1e-5), "mismatch (single-shot)"
    assert jnp.allclose(jnp.sum(jnp.exp(logits), axis=-1), 1.0, atol=1e-5)

    # --- tiled batch path (exercises grid / parallel semantics / padding) ------
    B2 = 40
    x2 = jax.random.normal(k_x2, (B2, num_inputs), dtype=jnp.float32)
    logits2 = categorical_1d_forward(x2, w, b, block_b=16)   # tb=16, grid=(3,)
    jax.block_until_ready(logits2)
    ref2 = _reference(x2, w, b)
    assert logits2.shape == (B2, num_outputs)
    assert jnp.allclose(logits2, ref2, atol=1e-5, rtol=1e-5), "mismatch (tiled)"
    assert jnp.allclose(jnp.sum(jnp.exp(logits2), axis=-1), 1.0, atol=1e-5)

    # TODO(synk): Categorical.sample / gumbel_softmax_sample / entropy are stateful
    # sampling utilities outside forward(); forward only produces normalized logits.

    print("KERNEL_OK")
</pallas_src>

<mosaic_0001>
module attributes {stable_mosaic.version = 11 : i64} {
  func.func @_categorical_linear_kernel(%arg0: memref<8x32xf32, #tpu.memory_space<vmem>>, %arg1: memref<32x128xf32, #tpu.memory_space<vmem>>, %arg2: memref<1x128xf32, #tpu.memory_space<vmem>>, %arg3: memref<8x128xf32, #tpu.memory_space<vmem>>) attributes {dimension_semantics = [], scalar_prefetch = 0 : i64, scratch_operands = 0 : i64, tpu.core_type = #tpu.core_type<tc>} {
    %c0 = arith.constant 0 : index
    %c0_0 = arith.constant 0 : index
    %0 = vector.load %arg0[%c0, %c0_0] : memref<8x32xf32, #tpu.memory_space<vmem>>, vector<8x32xf32>
    %c0_1 = arith.constant 0 : index
    %c0_2 = arith.constant 0 : index
    %1 = vector.load %arg1[%c0_1, %c0_2] : memref<32x128xf32, #tpu.memory_space<vmem>>, vector<32x128xf32>
    %cst = arith.constant dense<0.000000e+00> : vector<8x128xf32>
    %2 = tpu.matmul %0, %1, %cst {dimension_numbers = #tpu.dot_dimension_numbers<[1], [0], [0], [1], [0, 0, 1, 1], [], []>} : vector<8x32xf32>, vector<32x128xf32>, vector<8x128xf32> -> vector<8x128xf32>
    %c0_3 = arith.constant 0 : index
    %c0_4 = arith.constant 0 : index
    %3 = vector.load %arg2[%c0_3, %c0_4] : memref<1x128xf32, #tpu.memory_space<vmem>>, vector<1x128xf32>
    %4 = vector.broadcast %3 : vector<1x128xf32> to vector<8x128xf32>
    %5 = arith.addf %2, %4 : vector<8x128xf32>
    %cst_5 = arith.constant dense<0xFF800000> : vector<8xf32>
    %6 = vector.multi_reduction <maximumf>, %5, %cst_5 [1] : vector<8x128xf32> to vector<8xf32>
    %7 = vector.shape_cast %6 : vector<8xf32> to vector<8x1xf32>
    %8 = vector.broadcast %7 : vector<8x1xf32> to vector<8x128xf32>
    %9 = arith.subf %5, %8 : vector<8x128xf32>
    %10 = math.exp %9 : vector<8x128xf32>
    %cst_6 = arith.constant dense<0.000000e+00> : vector<8xf32>
    %11 = vector.multi_reduction <add>, %10, %cst_6 [1] : vector<8x128xf32> to vector<8xf32>
    %12 = vector.shape_cast %11 : vector<8xf32> to vector<8x1xf32>
    %13 = math.log %12 : vector<8x1xf32>
    %14 = arith.addf %7, %13 : vector<8x1xf32>
    %15 = vector.broadcast %14 : vector<8x1xf32> to vector<8x128xf32>
    %16 = arith.subf %5, %15 : vector<8x128xf32>
    %c0_7 = arith.constant 0 : index
    %c0_8 = arith.constant 0 : index
    %17 = vector.load %arg3[%c0_7, %c0_8] : memref<8x128xf32, #tpu.memory_space<vmem>>, vector<8x128xf32>
    tpu.vector_store %arg3[%c0_7, %c0_8], %16 {strides = array<i32>} : memref<8x128xf32, #tpu.memory_space<vmem>>, vector<8x128xf32>,
    return
  }
}

</mosaic_0001>

<bundles_post_ra>
// kernel: tpu_custom_call.1
= control target key start
LH: loop header
LB: loop body
LE: loop exit
PB: predicated region body
PF: predicated region fallthrough
CT: control target
= control target key end

     0   :  { %8 = vsyncpa [#allocation3], 0  ;;  %s337_s0 = inlined_call_operand.hbm [shape: f32[8,32], index: 0, kind: input, shape index: {}]   ;;  %s338_s1 = inlined_call_operand.hbm [shape: f32[32,128], index: 1, kind: input, shape index: {}]   ;;  %s339_s2 = inlined_call_operand.vmem [shape: f32[1,128], index: 2, kind: input, shape index: {}]   ;;  %s340_s3 = inlined_call_operand.hbm [shape: f32[8,128], index: 3, kind: output, shape index: {}]  }
   0x1   :  { %9 = vsyncpa [#allocation6], 0 }
   0x2   :  { %10 = vsyncpa [#allocation4], 0  ;;  %s263_s12 = smov [#allocation2]   ;;  %s264_s14 = smov [#allocation5]  }
   0x3   :  { %s17_s13 = sshll.u32 %s263_s12, 4  ;;  %s26_s15 = sshll.u32 %s264_s14, 4  ;;  %s18_s13 = int_to_ptr.vmem [resolvable:$true] %s17_s13  ;;  %s291_s15 = int_to_ptr.vmem [resolvable:$true] %s26_s15 }
   0x4   :  { %s191_s18 = scalar_lea.hbm %s337_s0, 128 }
   0x5   :  { %p192_p0 = scmp.ne.s32.totalorder %s337_s0, %s191_s18  ;;  %p195_p1 = scmp.lt.u32.totalorder %s191_s18, %s337_s0 }
   0x7   :  { %p197_p2 = pnand %p195_p1, %p192_p0 }
   0x9   :  { %200 = shalt.err (!%p197_p2)
}
   0xa   :  { %s201_s23 = scalar_lea.vmem %s18_s13, 128  ;;  %p206_p4 = scmp.lt.s32.totalorder %s18_s13, %s18_s13 }
   0xb   :  { %p202_p3 = scmp.ne.s32.totalorder %s18_s13, %s201_s23  ;;  %p207_p5 = scmp.lt.s32.totalorder %s201_s23, %s201_s23 }
   0xd   :  { %p208_p6 = por %p207_p5, %p206_p4 }
   0xf   :  { %p209_p7 = pnand %p208_p6, %p202_p3 }
  0x11   :  { %212 = shalt.err (!%p209_p7)
}
  0x12   :  { %20 = dma.hbm_to_vmem [thread:$0]  %s337_s0, 128, %s18_s13, [#allocation3]  }
  0x13   :  { %s213_s28 = scalar_lea.hbm %s338_s1, 512 }
  0x14   :  { %p214_p8 = scmp.ne.s32.totalorder %s338_s1, %s213_s28  ;;  %p217_p9 = scmp.lt.u32.totalorder %s213_s28, %s338_s1 }
  0x16   :  { %p219_p10 = pnand %p217_p9, %p214_p8 }
  0x18   :  { %222 = shalt.err (!%p219_p10)
}
  0x19   :  { %s223_s6 = scalar_lea.vmem %s291_s15, 512  ;;  %p228_p12 = scmp.lt.s32.totalorder %s291_s15, %s291_s15 }
  0x1a   :  { %p224_p11 = scmp.ne.s32.totalorder %s291_s15, %s223_s6  ;;  %p229_p13 = scmp.lt.s32.totalorder %s223_s6, %s223_s6 }
  0x1c   :  { %p230_p0 = por %p229_p13, %p228_p12 }
  0x1e   :  { %p231_p1 = pnand %p230_p0, %p224_p11 }
  0x20   :  { %234 = shalt.err (!%p231_p1)
}
  0x21   :  { %s265_s0 = smov 128   ;;  %s266_s7 = smov 8  }
  0x22   :  { %32 = dma.hbm_to_vmem [thread:$0]  %s338_s1, 512, %s291_s15, [#allocation6], %s265_s0, %s265_s0, %s266_s7  }
  0x23   :  { %257 = dma.done.wait [#allocation3], 128  }
  0x24   :  { %258 = vsyncadd [#allocation3], 4294967168 }
  0x25   :  { %259 = dma.done.wait [#allocation6], 512  }
  0x26   :  { %260 = vsyncadd [#allocation6], 4294966784  ;;  %v267_v0 = vmov 0.0|0.0   ;;  %vm268_vm0 = vmmov 0   ;;  %v269_v1 = vmov 0.0   ;;  %v42_v2 = vld [vmem:[#allocation5] sm:$0xff] }
  0x27   :  { %173 = vmatprep.subr.bf16.mxu0 %v267_v0  ;;  %170 = vmatprep.mubr.msk.f32.mxu0 %vm268_vm0, %v269_v1  ;;  %v43_v3 = vld [vmem:[#allocation5 + $0x8] sm:$0xff]  ;;  %v44_v4 = vld [vmem:[#allocation5 + $0x10] sm:$0xff]  ;;  %v45_v6 = vld [vmem:[#allocation5 + $0x18] sm:$0xff]  ;;  %vm53_vm1 = vcmask 261120   ;;  %s270_s11 = smov [#allocation7]  }
  0x28   :  { %v174_v5 = vpack.c.bf16 %v43_v3, %v42_v2  ;;  %v177_v7 = vpack.c.bf16 %v45_v6, %v44_v4  ;;  %v41_v8 = vld [vmem:[#allocation2] sm:$0xff]  ;;  %s145_s12 = sshll.u32 %s270_s11, 4  ;;  %s146_s12 = int_to_ptr.vmem [resolvable:$true] %s145_s12 }
  0x29   :  { %v155_v9 = vld [vmem:[%s339_s2] ss:$0 sm:$0xff]  ;;  %s235_s2 = scalar_lea.vmem %s146_s12, 128  ;;  %p240_p3 = scmp.lt.s32.totalorder %s146_s12, %s146_s12 }
  0x2a   :  { %175 = vmatpush3.bf16.msra.mxu0 %v174_v5  ;;  %p236_p2 = scmp.ne.s32.totalorder %s146_s12, %s235_s2  ;;  %p241_p4 = scmp.lt.s32.totalorder %s235_s2, %s235_s2 }
  0x2b   :  { %176 = vmatprep.subr.bf16.mxu0 %v267_v0 }
  0x2c   :  { %p242_p5 = por %p241_p4, %p240_p3 }
  0x2e   :  { %178 = vmatpush3.bf16.msra.mxu0 %v177_v7  ;;  %p243_p6 = pnand %p242_p5, %p236_p2 }
  0x31   :  { %171 = vmatmul.mubr.msk.f32.vlgmr.msra.gmra.mrb[0].mxu0 %vm53_vm1, %v41_v8 }
 0x104   :  { %v123_v10 = vpop.f32.mrb[0].mxu0 }
 0x105   :  { %v124_v11 = vadd.f32 %v155_v9, %v123_v10  ;;  %v172_v12 = vpop.f32.mrb[1].mxu0 }
 0x107   :  { %127 = vmax.xlane.f32.xlu0 %v124_v11 }
 0x194   :  { %v128_v13 = vpop.xlane.xlu0 %127 }
 0x195   :  { %v129_v14 = vsub.f32 %v124_v11, %v128_v13 }
 0x197   :  { %v130_v15 = vmul.f32 1.442695, %v129_v14 }
 0x199   :  { %187 = vpow2.f32 %v130_v15 }
 0x1a3   :  { %v188_v16 = vpop.eup %187 }
 0x1a4   :  { %132 = vadd.xlane.f32.xlu0 %v188_v16 }
 0x231   :  { %v133_v17 = vpop.xlane.xlu0 %132 }
 0x232   :  { %189 = vlog2.f32 %v133_v17 }
 0x23c   :  { %v190_v18 = vpop.eup %189 }
 0x23d   :  { %v135_v19 = vmul.f32 0.6931472, %v190_v18 }
 0x23f   :  { %v136_v20 = vadd.f32 %v135_v19, %v128_v13 }
 0x241   :  { %v137_v21 = vsub.f32 %v124_v11, %v136_v20 }
 0x243   :  { %138 = vst [vmem:[#allocation7] sm:$0xff] %v137_v21 }
 0x244   :  { %246 = shalt.err (!%p243_p6)
}
 0x245   :  { %s247_s15 = scalar_lea.hbm %s340_s3, 128 }
 0x246   :  { %p248_p7 = scmp.ne.s32.totalorder %s340_s3, %s247_s15  ;;  %p251_p8 = scmp.lt.u32.totalorder %s247_s15, %s340_s3 }
 0x248   :  { %p253_p9 = pnand %p251_p8, %p248_p7 }
 0x24a   :  { %256 = shalt.err (!%p253_p9)
}
 0x24b   :  { %148 = dma.vmem_to_hbm [thread:$0]  %s146_s12, 128, %s340_s3, [#allocation4]  }
 0x24c   :  { %261 = dma.done.wait [#allocation4], 128  }
 0x24d   :  { %262 = vsyncadd [#allocation4], 4294967168 }
 0x24e   :  { %152 = vsyncpa [#allocation3], 1 }
 0x24f   :  { %153 = vsyncpa [#allocation6], 1 }
 0x250   :  { %154 = vsyncpa [#allocation4], 1 }

</bundles_post_ra>
